<compile_context>
chip_gen: v6e
topology: v6e:2x2x1
jax: 0.10.0
libtpu: 0.0.40
codegen_flags: <defaults>
</compile_context>

<pallas_src>
import jax
import jax.numpy as jnp
from jax.experimental import pallas as pl
from jax.experimental.pallas import tpu as pltpu


def _aspp_kernel(x_ref, w_ref, shift_ref, o_ref, acc_ref):
    # x_ref:     (tk, thw)    channel-tap tile x pixel tile (lane = pixels)
    # w_ref:     (Cout, tk)   conv-weight tile with the BN scale pre-folded per row
    # shift_ref: (Cout, 1)    BN shift = beta - mean * scale
    # o_ref:     (Cout, thw)  output tile (revisited across the reduction axis)
    # acc_ref:   (Cout, thw)  f32 accumulator scratch
    k = pl.program_id(2)

    @pl.when(k == 0)
    def _init():
        acc_ref[...] = jnp.zeros_like(acc_ref)

    acc_ref[...] += jnp.dot(w_ref[...], x_ref[...],
                            preferred_element_type=jnp.float32)

    @pl.when(k == pl.num_programs(2) - 1)
    def _epilogue():
        y = acc_ref[...] + shift_ref[...]
        o_ref[...] = jnp.maximum(y, 0.0).astype(o_ref.dtype)


def _round_up(x, m):
    return (x + m - 1) // m * m


def _round_down(x, m):
    return max(m, x // m * m)


def _im2col_nchw(x, kernel_size, padding, dilation):
    """(N, Cin, H, W) -> (N, Cin*K*K, H_out*W_out); tap order matches
    weight.reshape(Cout, Cin*K*K).  K==1/padding==0 is a pure reshape (no copy)."""
    n, cin, h, w = x.shape
    k, p, d = kernel_size, padding, dilation
    h_out = h + 2 * p - d * (k - 1)
    w_out = w + 2 * p - d * (k - 1)
    assert h_out > 0 and w_out > 0, "invalid conv geometry"
    if k == 1 and p == 0:
        return x.reshape(n, cin, h * w), h_out, w_out
    xp = jnp.pad(x, ((0, 0), (0, 0), (p, p), (p, p))) if p > 0 else x
    taps = []
    for ki in range(k):
        for kj in range(k):
            taps.append(xp[:, :, ki * d:ki * d + h_out, kj * d:kj * d + w_out])
    patches = jnp.stack(taps, axis=2)               # (N, Cin, K*K, H_out, W_out)
    return patches.reshape(n, cin * k * k, h_out * w_out), h_out, w_out


def _tpu_vmem_and_align():
    """(per-core VMEM capacity bytes, lane/contraction tile alignment)."""
    try:
        kind = jax.devices()[0].device_kind.lower()
    except Exception:
        kind = ""
    try:
        cap = int(pltpu.get_tpu_info().vmem_capacity_bytes)
    except Exception:
        # v5e/v6e: 128 MiB per TensorCore; v7x (and unknown): be conservative, 64 MiB.
        cap = (128 << 20) if ("v5" in kind or "v6" in kind) else (64 << 20)
    # v6e/v7x MXU is 2x 256x256 -> 256-aligned tiles; 128 is optimal on v4/v5e.
    is_v6_or_v7 = ("v6" in kind or "v7" in kind or "tpu7" in kind or "7x" in kind)
    align = 256 if is_v6_or_v7 else 128
    return cap, align


def _pick_cin_tile(cin_eff, align, max_tk=2048):
    """Contraction-axis tile: full extent when small, else a roughly balanced
    multiple of `align` capped at max_tk (review recommendation: 512-2048)."""
    if cin_eff <= max_tk:
        return cin_eff
    n_k = pl.cdiv(cin_eff, max_tk)
    return _round_up(pl.cdiv(cin_eff, n_k), align)


def _pick_hw_tile(hw_pad, tk, cout, op_isz, out_isz, budget, align, cap=2048):
    """Largest pixel tile (multiple of `align`, <= cap) whose *real* VMEM footprint
    (double-buffered activation + output blocks, f32 accumulator, resident
    double-buffered weight block) fits `budget`."""
    fixed = 2 * cout * tk * op_isz + 2 * cout * 4            # weight blocks + shift
    per_pixel = 2 * tk * op_isz + 2 * cout * out_isz + 4 * cout
    avail = max(budget - fixed, per_pixel * align)
    t = min(cap, hw_pad, _round_down(avail // per_pixel, align))
    return max(t, align)


def aspp_forward(x, weight, bn_gamma, bn_beta, bn_mean, bn_var, *,
                 padding, dilation, eps=1e-5,
                 operand_dtype=jnp.bfloat16, out_dtype=None,
                 hw_tile=None, cin_tile=None):
    """Fused _ASPPModule forward (eval-mode BatchNorm running statistics).

    x:      (N, Cin, H, W) float32, NCHW
    weight: (Cout, Cin, K, K) PyTorch OIHW atrous-conv weight (bias-free)
    bn_*:   (Cout,) BatchNorm2d weight / bias / running_mean / running_var
    operand_dtype: matmul operand dtype (default bf16; accumulation is always f32).
        Note: even with f32 operands the MXU uses default (~bf16) operand precision.
    out_dtype: output dtype (default: x.dtype).
    returns (N, Cout, H_out, W_out)
    """
    n, cin, h, w = x.shape
    cout, cin_w, kh, kw = weight.shape
    assert cin == cin_w and kh == kw
    ksize = kh
    out_dtype = jnp.dtype(x.dtype if out_dtype is None else out_dtype)
    op_dtype = jnp.dtype(x.dtype if operand_dtype is None else operand_dtype)

    patches, h_out, w_out = _im2col_nchw(x, ksize, padding, dilation)
    cin_eff = cin * ksize * ksize
    hw = h_out * w_out

    # Fold eval-mode BN into the conv: scale into the weight rows, shift separate.
    scale = bn_gamma.astype(jnp.float32) / jnp.sqrt(bn_var.astype(jnp.float32) + eps)
    shift = (bn_beta.astype(jnp.float32)
             - bn_mean.astype(jnp.float32) * scale).reshape(cout, 1)
    w2d = (weight.reshape(cout, cin_eff).astype(jnp.float32)
           * scale[:, None]).astype(op_dtype)
    patches = patches.astype(op_dtype)

    # Per-chip VMEM budget and MXU-friendly alignment.
    vmem_cap, align = _tpu_vmem_and_align()
    vmem_limit = max(min(vmem_cap - (16 << 20), 112 << 20), 32 << 20)
    tile_budget = int(vmem_limit * 0.75)       # headroom for compiler-internal scratch

    op_isz = op_dtype.itemsize
    out_isz = out_dtype.itemsize

    tk = cin_tile if cin_tile is not None else _pick_cin_tile(cin_eff, align)
    cin_pad = _round_up(cin_eff, tk)
    hw_pad = _round_up(hw, align)
    thw = hw_tile if hw_tile is not None else _pick_hw_tile(
        hw_pad, tk, cout, op_isz, out_isz, tile_budget, align)
    # v7x shards the parallel grid axes over 2 TensorCores: make sure there are at
    # least two blocks of work even when N == 1 (harmless extra step on v5e/v6e).
    if n * pl.cdiv(hw_pad, thw) < 2 and hw_pad >= 2 * align:
        thw = _round_down(hw_pad // 2, align)

    # Zero-pad: the contraction axis must be an exact multiple of tk (garbage must
    # never enter the accumulator); the pixel axis is padded to lane alignment and
    # the padded columns are sliced off below.
    if cin_pad != cin_eff or hw_pad != hw:
        patches = jnp.pad(patches,
                          ((0, 0), (0, cin_pad - cin_eff), (0, hw_pad - hw)))
    if cin_pad != cin_eff:
        w2d = jnp.pad(w2d, ((0, 0), (0, cin_pad - cin_eff)))

    grid = (n, pl.cdiv(hw_pad, thw), cin_pad // tk)

    cost = pl.CostEstimate(
        flops=2 * n * hw_pad * cin_pad * cout,
        transcendentals=0,
        bytes_accessed=(n * cin_pad * hw_pad * op_isz                 # activations
                        + n * grid[1] * cout * cin_pad * op_isz       # weight re-reads
                        + n * cout * hw_pad * out_isz + cout * 4),
    )

    def _build(single_buffer_shift):
        if single_buffer_shift:
            # Constant-index block: one VMEM copy is enough.
            shift_spec = pl.BlockSpec((cout, 1), lambda b, t, k: (0, 0),
                                      pipeline_mode=pl.Buffered(1))
        else:
            shift_spec = pl.BlockSpec((cout, 1), lambda b, t, k: (0, 0))
        return pl.pallas_call(
            _aspp_kernel,
            out_shape=jax.ShapeDtypeStruct((n, cout, hw_pad), out_dtype),
            grid_spec=pltpu.PrefetchScalarGridSpec(
                num_scalar_prefetch=0,
                grid=grid,
                in_specs=[
                    # activation tile: batch squeezed, taps on sublanes, pixels on lanes
                    pl.BlockSpec((None, tk, thw), lambda b, t, k: (b, k, t)),
                    # scale-folded weight tile: marches along the contraction axis
                    pl.BlockSpec((cout, tk), lambda b, t, k: (0, k)),
                    shift_spec,
                ],
                out_specs=pl.BlockSpec((None, cout, thw), lambda b, t, k: (b, 0, t)),
                scratch_shapes=[pltpu.VMEM((cout, thw), jnp.float32)],
            ),
            compiler_params=pltpu.CompilerParams(
                dimension_semantics=("parallel", "parallel", "arbitrary"),
                vmem_limit_bytes=int(vmem_limit),
            ),
            cost_estimate=cost,
        )

    try:
        out = _build(True)(patches, w2d, shift)
    except Exception:
        # pl.Buffered support on pallas_call BlockSpecs varies across jax versions;
        # the shift block is tiny, so fall back to default double-buffering.
        out = _build(False)(patches, w2d, shift)

    return out[:, :, :hw].reshape(n, cout, h_out, w_out)   # pure reshape, no transpose


def init_aspp_params(key, inplanes, planes, kernel_size):
    """Conv weight via kaiming_normal_ (like _init_weight); BN stats perturbed so the
    scale/shift fold is actually exercised.  gamma is a power-of-two multiple of
    sqrt(var+eps), so the folded BN scale is an exact power of two and the bf16 cast
    of (scale * weight) stays exact -> the test can keep a tight f32 tolerance."""
    kw_, kg, kb, km, kv = jax.random.split(key, 5)
    fan_in = inplanes * kernel_size * kernel_size
    std = (2.0 / fan_in) ** 0.5
    weight = std * jax.random.normal(
        kw_, (planes, inplanes, kernel_size, kernel_size), dtype=jnp.float32)
    var = 1.0 + 0.1 * jax.random.uniform(kv, (planes,), dtype=jnp.float32)
    exp = jax.random.randint(kg, (planes,), -1, 2).astype(jnp.float32)   # {-1,0,1}
    gamma = jnp.exp2(exp) * jnp.sqrt(var + 1e-5)
    beta = 0.1 * jax.random.normal(kb, (planes,), dtype=jnp.float32)
    mean = 0.1 * jax.random.normal(km, (planes,), dtype=jnp.float32)
    return weight, gamma, beta, mean, var


def aspp_reference(x, weight, gamma, beta, mean, var, *, padding, dilation, eps=1e-5):
    conv = jax.lax.conv_general_dilated(
        x, weight, window_strides=(1, 1),
        padding=[(padding, padding), (padding, padding)],
        rhs_dilation=(dilation, dilation),
        dimension_numbers=("NCHW", "OIHW", "NCHW"),
        precision=jax.lax.Precision.HIGHEST)
    bn = (conv - mean.reshape(1, -1, 1, 1)) / jnp.sqrt(var.reshape(1, -1, 1, 1) + eps)
    bn = gamma.reshape(1, -1, 1, 1) * bn + beta.reshape(1, -1, 1, 1)
    return jnp.maximum(bn, 0.0)


def _bf16_representable(a):
    # Round inputs to bf16-representable f32 so the numeric check is insensitive to
    # the (default) bf16 operand dtype of the kernel's MXU matmul.
    return a.astype(jnp.bfloat16).astype(jnp.float32)


if __name__ == "__main__":
    key = jax.random.PRNGKey(0)
    k_x, k_p1, k_p3 = jax.random.split(key, 3)

    n, inplanes, h, w = 2, 4, 16, 16
    planes = 8

    x = _bf16_representable(
        jax.random.normal(k_x, (n, inplanes, h, w), dtype=jnp.float32))

    # the two ASPP branch flavours: 1x1 conv and 3x3 atrous conv
    configs = [
        (k_p1, 1, 0, 1),    # kernel_size=1, padding=0, dilation=1
        (k_p3, 3, 2, 2),    # kernel_size=3, padding=2, dilation=2
    ]
    for kp, ks, pad, dil in configs:
        weight, gamma, beta, mean, var = init_aspp_params(kp, inplanes, planes, ks)
        weight = _bf16_representable(weight)

        out = aspp_forward(x, weight, gamma, beta, mean, var,
                           padding=pad, dilation=dil)
        out = jax.block_until_ready(out)

        ref = aspp_reference(x, weight, gamma, beta, mean, var,
                             padding=pad, dilation=dil)
        assert out.shape == ref.shape == (n, planes, h, w), (out.shape, ref.shape)
        err = float(jnp.max(jnp.abs(out - ref)))
        assert jnp.allclose(out, ref, atol=1e-4, rtol=1e-4), err

    print("KERNEL_OK")
</pallas_src>

<mosaic_0001>
module attributes {stable_mosaic.version = 11 : i64} {
  func.func @_aspp_kernel(%arg0: i32, %arg1: i32, %arg2: i32, %arg3: memref<1x4x256xbf16, #tpu.memory_space<vmem>>, %arg4: memref<8x4xbf16, #tpu.memory_space<vmem>>, %arg5: memref<8x1xf32, #tpu.memory_space<vmem>>, %arg6: memref<1x8x256xf32, #tpu.memory_space<vmem>>, %arg7: memref<8x256xf32, #tpu.memory_space<vmem>>) attributes {dimension_semantics = [#tpu.dimension_semantics<parallel>, #tpu.dimension_semantics<parallel>, #tpu.dimension_semantics<arbitrary>], iteration_bounds = array<i64: 2, 1, 1>, scalar_prefetch = 0 : i64, scratch_operands = 1 : i64, tpu.core_type = #tpu.core_type<tc>, window_params = [{transform_indices = @transform_0, window_bounds = array<i64: 1, 4, 256>}, {transform_indices = @transform_1, window_bounds = array<i64: 8, 4>}, {pipeline_mode = #tpu.pipeline_mode<synchronous>, transform_indices = @transform_2, window_bounds = array<i64: 8, 1>}, {transform_indices = @transform_3, window_bounds = array<i64: 1, 8, 256>}]} {
    %c0_i32 = arith.constant 0 : i32
    %0 = arith.cmpi eq, %arg2, %c0_i32 : i32
    %1 = arith.extui %0 : i1 to i32
    %c0_i32_0 = arith.constant 0 : i32
    %2 = arith.cmpi ne, %1, %c0_i32_0 : i32
    scf.if %2 {
      %cst_11 = arith.constant 0.000000e+00 : f32
      %13 = vector.broadcast %cst_11 : f32 to vector<8x256xf32>
      %c0_12 = arith.constant 0 : index
      %c0_13 = arith.constant 0 : index
      %14 = vector.load %arg7[%c0_12, %c0_13] : memref<8x256xf32, #tpu.memory_space<vmem>>, vector<8x256xf32>
      tpu.vector_store %arg7[%c0_12, %c0_13], %13 {strides = array<i32>} : memref<8x256xf32, #tpu.memory_space<vmem>>, vector<8x256xf32>,
    } else {
    }
    %c0 = arith.constant 0 : index
    %c0_1 = arith.constant 0 : index
    %3 = vector.load %arg7[%c0, %c0_1] : memref<8x256xf32, #tpu.memory_space<vmem>>, vector<8x256xf32>
    %c0_2 = arith.constant 0 : index
    %c0_3 = arith.constant 0 : index
    %4 = vector.load %arg4[%c0_2, %c0_3] : memref<8x4xbf16, #tpu.memory_space<vmem>>, vector<8x4xbf16>
    %c0_4 = arith.constant 0 : index
    %c0_5 = arith.constant 0 : index
    %c0_6 = arith.constant 0 : index
    %5 = vector.load %arg3[%c0_4, %c0_5, %c0_6] : memref<1x4x256xbf16, #tpu.memory_space<vmem>>, vector<1x4x256xbf16>
    %6 = vector.shape_cast %5 : vector<1x4x256xbf16> to vector<4x256xbf16>
    %cst = arith.constant dense<0.000000e+00> : vector<8x256xf32>
    %7 = tpu.matmul %4, %6, %cst {dimension_numbers = #tpu.dot_dimension_numbers<[1], [0], [0], [1], [0, 0, 1, 1], [], []>} : vector<8x4xbf16>, vector<4x256xbf16>, vector<8x256xf32> -> vector<8x256xf32>
    %8 = arith.addf %3, %7 : vector<8x256xf32>
    %c0_7 = arith.constant 0 : index
    %c0_8 = arith.constant 0 : index
    %9 = vector.load %arg7[%c0_7, %c0_8] : memref<8x256xf32, #tpu.memory_space<vmem>>, vector<8x256xf32>
    tpu.vector_store %arg7[%c0_7, %c0_8], %8 {strides = array<i32>} : memref<8x256xf32, #tpu.memory_space<vmem>>, vector<8x256xf32>,
    %c0_i32_9 = arith.constant 0 : i32
    %10 = arith.cmpi eq, %arg2, %c0_i32_9 : i32
    %11 = arith.extui %10 : i1 to i32
    %c0_i32_10 = arith.constant 0 : i32
    %12 = arith.cmpi ne, %11, %c0_i32_10 : i32
    scf.if %12 {
      %c0_11 = arith.constant 0 : index
      %c0_12 = arith.constant 0 : index
      %13 = vector.load %arg7[%c0_11, %c0_12] : memref<8x256xf32, #tpu.memory_space<vmem>>, vector<8x256xf32>
      %c0_13 = arith.constant 0 : index
      %c0_14 = arith.constant 0 : index
      %14 = vector.load %arg5[%c0_13, %c0_14] : memref<8x1xf32, #tpu.memory_space<vmem>>, vector<8x1xf32>
      %15 = vector.broadcast %14 : vector<8x1xf32> to vector<8x256xf32>
      %16 = arith.addf %13, %15 : vector<8x256xf32>
      %cst_15 = arith.constant 0.000000e+00 : f32
      %17 = vector.broadcast %cst_15 : f32 to vector<8x256xf32>
      %18 = arith.maximumf %16, %17 : vector<8x256xf32>
      %c0_16 = arith.constant 0 : index
      %c0_17 = arith.constant 0 : index
      %c0_18 = arith.constant 0 : index
      %19 = vector.load %arg6[%c0_16, %c0_17, %c0_18] : memref<1x8x256xf32, #tpu.memory_space<vmem>>, vector<1x8x256xf32>
      %20 = vector.shape_cast %19 : vector<1x8x256xf32> to vector<8x256xf32>
      %21 = vector.shape_cast %18 : vector<8x256xf32> to vector<1x8x256xf32>
      tpu.vector_store %arg6[%c0_16, %c0_17, %c0_18], %21 {strides = array<i32>} : memref<1x8x256xf32, #tpu.memory_space<vmem>>, vector<1x8x256xf32>,
    } else {
    }
    return
  }
  func.func @transform_0(%arg0: i32, %arg1: i32, %arg2: i32) -> (i32, i32, i32) {
    %c0_i32 = arith.constant 0 : i32
    return %arg0, %arg2, %arg1 : i32, i32, i32
  }
  func.func @transform_1(%arg0: i32, %arg1: i32, %arg2: i32) -> (i32, i32) {
    %c0_i32 = arith.constant 0 : i32
    %c0_i32_0 = arith.constant 0 : i32
    return %c0_i32, %arg2 : i32, i32
  }
  func.func @transform_2(%arg0: i32, %arg1: i32, %arg2: i32) -> (i32, i32) {
    %c0_i32 = arith.constant 0 : i32
    %c0_i32_0 = arith.constant 0 : i32
    %c0_i32_1 = arith.constant 0 : i32
    return %c0_i32, %c0_i32_0 : i32, i32
  }
  func.func @transform_3(%arg0: i32, %arg1: i32, %arg2: i32) -> (i32, i32, i32) {
    %c0_i32 = arith.constant 0 : i32
    %c0_i32_0 = arith.constant 0 : i32
    return %arg0, %c0_i32, %arg1 : i32, i32, i32
  }
}

module attributes {stable_mosaic.version = 11 : i64} {
  func.func @_aspp_kernel(%arg0: i32, %arg1: i32, %arg2: i32, %arg3: memref<1x4x256xbf16, #tpu.memory_space<vmem>>, %arg4: memref<8x4xbf16, #tpu.memory_space<vmem>>, %arg5: memref<8x1xf32, #tpu.memory_space<vmem>>, %arg6: memref<1x8x256xf32, #tpu.memory_space<vmem>>, %arg7: memref<8x256xf32, #tpu.memory_space<vmem>>) attributes {dimension_semantics = [#tpu.dimension_semantics<parallel>, #tpu.dimension_semantics<parallel>, #tpu.dimension_semantics<arbitrary>], iteration_bounds = array<i64: 2, 1, 1>, scalar_prefetch = 0 : i64, scratch_operands = 1 : i64, tpu.core_type = #tpu.core_type<tc>, window_params = [{transform_indices = @transform_0, window_bounds = array<i64: 1, 4, 256>}, {transform_indices = @transform_1, window_bounds = array<i64: 8, 4>}, {pipeline_mode = #tpu.pipeline_mode<synchronous>, transform_indices = @transform_2, window_bounds = array<i64: 8, 1>}, {transform_indices = @transform_3, window_bounds = array<i64: 1, 8, 256>}]} {
    %c0_i32 = arith.constant 0 : i32
    %0 = arith.cmpi eq, %arg2, %c0_i32 : i32
    %1 = arith.extui %0 : i1 to i32
    %c0_i32_0 = arith.constant 0 : i32
    %2 = arith.cmpi ne, %1, %c0_i32_0 : i32
    scf.if %2 {
      %cst_11 = arith.constant 0.000000e+00 : f32
      %13 = vector.broadcast %cst_11 : f32 to vector<8x256xf32>
      %c0_12 = arith.constant 0 : index
      %c0_13 = arith.constant 0 : index
      %14 = vector.load %arg7[%c0_12, %c0_13] : memref<8x256xf32, #tpu.memory_space<vmem>>, vector<8x256xf32>
      tpu.vector_store %arg7[%c0_12, %c0_13], %13 {strides = array<i32>} : memref<8x256xf32, #tpu.memory_space<vmem>>, vector<8x256xf32>,
    } else {
    }
    %c0 = arith.constant 0 : index
    %c0_1 = arith.constant 0 : index
    %3 = vector.load %arg7[%c0, %c0_1] : memref<8x256xf32, #tpu.memory_space<vmem>>, vector<8x256xf32>
    %c0_2 = arith.constant 0 : index
    %c0_3 = arith.constant 0 : index
    %4 = vector.load %arg4[%c0_2, %c0_3] : memref<8x4xbf16, #tpu.memory_space<vmem>>, vector<8x4xbf16>
    %c0_4 = arith.constant 0 : index
    %c0_5 = arith.constant 0 : index
    %c0_6 = arith.constant 0 : index
    %5 = vector.load %arg3[%c0_4, %c0_5, %c0_6] : memref<1x4x256xbf16, #tpu.memory_space<vmem>>, vector<1x4x256xbf16>
    %6 = vector.shape_cast %5 : vector<1x4x256xbf16> to vector<4x256xbf16>
    %cst = arith.constant dense<0.000000e+00> : vector<8x256xf32>
    %7 = tpu.matmul %4, %6, %cst {dimension_numbers = #tpu.dot_dimension_numbers<[1], [0], [0], [1], [0, 0, 1, 1], [], []>} : vector<8x4xbf16>, vector<4x256xbf16>, vector<8x256xf32> -> vector<8x256xf32>
    %8 = arith.addf %3, %7 : vector<8x256xf32>
    %c0_7 = arith.constant 0 : index
    %c0_8 = arith.constant 0 : index
    %9 = vector.load %arg7[%c0_7, %c0_8] : memref<8x256xf32, #tpu.memory_space<vmem>>, vector<8x256xf32>
    tpu.vector_store %arg7[%c0_7, %c0_8], %8 {strides = array<i32>} : memref<8x256xf32, #tpu.memory_space<vmem>>, vector<8x256xf32>,
    %c0_i32_9 = arith.constant 0 : i32
    %10 = arith.cmpi eq, %arg2, %c0_i32_9 : i32
    %11 = arith.extui %10 : i1 to i32
    %c0_i32_10 = arith.constant 0 : i32
    %12 = arith.cmpi ne, %11, %c0_i32_10 : i32
    scf.if %12 {
      %c0_11 = arith.constant 0 : index
      %c0_12 = arith.constant 0 : index
      %13 = vector.load %arg7[%c0_11, %c0_12] : memref<8x256xf32, #tpu.memory_space<vmem>>, vector<8x256xf32>
      %c0_13 = arith.constant 0 : index
      %c0_14 = arith.constant 0 : index
      %14 = vector.load %arg5[%c0_13, %c0_14] : memref<8x1xf32, #tpu.memory_space<vmem>>, vector<8x1xf32>
      %15 = vector.broadcast %14 : vector<8x1xf32> to vector<8x256xf32>
      %16 = arith.addf %13, %15 : vector<8x256xf32>
      %cst_15 = arith.constant 0.000000e+00 : f32
      %17 = vector.broadcast %cst_15 : f32 to vector<8x256xf32>
      %18 = arith.maximumf %16, %17 : vector<8x256xf32>
      %c0_16 = arith.constant 0 : index
      %c0_17 = arith.constant 0 : index
      %c0_18 = arith.constant 0 : index
      %19 = vector.load %arg6[%c0_16, %c0_17, %c0_18] : memref<1x8x256xf32, #tpu.memory_space<vmem>>, vector<1x8x256xf32>
      %20 = vector.shape_cast %19 : vector<1x8x256xf32> to vector<8x256xf32>
      %21 = vector.shape_cast %18 : vector<8x256xf32> to vector<1x8x256xf32>
      tpu.vector_store %arg6[%c0_16, %c0_17, %c0_18], %21 {strides = array<i32>} : memref<1x8x256xf32, #tpu.memory_space<vmem>>, vector<1x8x256xf32>,
    } else {
    }
    return
  }
  func.func @transform_0(%arg0: i32, %arg1: i32, %arg2: i32) -> (i32, i32, i32) {
    %c0_i32 = arith.constant 0 : i32
    return %arg0, %arg2, %arg1 : i32, i32, i32
  }
  func.func @transform_1(%arg0: i32, %arg1: i32, %arg2: i32) -> (i32, i32) {
    %c0_i32 = arith.constant 0 : i32
    %c0_i32_0 = arith.constant 0 : i32
    return %c0_i32, %arg2 : i32, i32
  }
  func.func @transform_2(%arg0: i32, %arg1: i32, %arg2: i32) -> (i32, i32) {
    %c0_i32 = arith.constant 0 : i32
    %c0_i32_0 = arith.constant 0 : i32
    %c0_i32_1 = arith.constant 0 : i32
    return %c0_i32, %c0_i32_0 : i32, i32
  }
  func.func @transform_3(%arg0: i32, %arg1: i32, %arg2: i32) -> (i32, i32, i32) {
    %c0_i32 = arith.constant 0 : i32
    %c0_i32_0 = arith.constant 0 : i32
    return %arg0, %c0_i32, %arg1 : i32, i32, i32
  }
}

</mosaic_0001>

<bundles_post_ra>
// kernel: tpu_custom_call.1
= control target key start
LH: loop header
LB: loop body
LE: loop exit
PB: predicated region body
PF: predicated region fallthrough
CT: control target
= control target key end

     0   :  { %8 = vsyncpa [#allocation4], 0  ;;  %s735_s0 = inlined_call_operand.vmem [shape: bf16[2,4,256], index: 0, kind: input, shape index: {}]   ;;  %s736_s1 = inlined_call_operand.vmem [shape: bf16[8,4], index: 1, kind: input, shape index: {}]   ;;  %s737_s2 = inlined_call_operand.vmem [shape: f32[8,1], index: 2, kind: input, shape index: {}]   ;;  %s738_s3 = inlined_call_operand.hbm [shape: f32[2,8,256], index: 3, kind: output, shape index: {}]  }
   0x1   :  { %10 = vsyncpa [#allocation4 + $0x1], 0  ;;  %s624_s12 = smov 0   ;;  %s626_s13 = smov 0  }
   0x2   :  { %s628_s14 = smov 0   ;;  %s630_s15 = smov 0  }
   0x3   :  { %s632_s16 = smov 0   ;;  %s634_s17 = smov 0  }
   0x4 LB: > { %s448_s18 = sadd.s32 4294967295, %s600_s17   ;;  %s449_s19 = sadd.s32 4294967294, %s600_s17   ;;  %s600_s17 = sphi %s634_s17, %s16_s17   ;;  %s596_s16 = sphi %s632_s16, %s745_s16   ;;  %s592_s15 = sphi %s630_s15, %s744_s15   ;;  %s588_s14 = sphi %s628_s14, %s743_s14   ;;  %s584_s13 = sphi %s626_s13, %s742_s13   ;;  %s580_s12 = sphi %s624_s12, %s741_s12  }
   0x5   : > { %s35_s20 = sadd.s32 1, %s596_s16  ;;  %s121_s21 = sadd.s32 1, %s588_s14 }
   0x6   : > { %p37_p0 = scmp.ge.s32.totalorder %s35_s20, 2  ;;  %p131_p1 = scmp.ne.s32.totalorder %s588_s14, %s584_s13 }
   0x7   : > { %p132_p2 = scmp.eq.s32.totalorder %s448_s18, 1  ;;  %p137_p3 = scmp.ne.s32.totalorder %s584_s13, %s580_s12 }
   0x8   : > { %s747_s20 = smov (%p37_p0, %s35_s20), 0  ;;  %p138_p5 = scmp.eq.s32.totalorder %s449_s19, 1 }
   0x9   : > { %p664_p4 = por %p132_p2, %p131_p1  ;;  %s116_s23 = ssub.s32 %s596_s16, %s747_s20 }
   0xa   : > { %p453_p6 = scmp.ge.s32.totalorder %s600_s17, 1  ;;  %p119_p7 = scmp.eq.s32.totalorder %s116_s23, 0 }
   0xb   : > { %p671_p8 = por %p138_p5, %p137_p3  ;;  %p183_p9 = scmp.lt.s32.totalorder %s600_s17, 3 }
   0xc   : > { %s677_s25 = scalar_select %p119_p7, %s588_s14, %s121_s21  }
   0xd   : > { %p184_p10 = pnand %p453_p6, %p183_p9 }
   0xe   : > { %p220_p11 = scmp.lt.s32.totalorder (!%p184_p10), %s592_s15, 1  ;;  %s216_s8 = sand.u32 (!%p184_p10), 1, %s584_s13  }
   0xf   : > { %187 = sbr.rel (%p184_p10) target bundleno = 243 (0xf3), region = 32  ;;  %s454_s9 = sshll.u32 (!%p184_p10), %s216_s8, 4 }
  0x10   : > { %s466_s10 = sshll.u32 (!%p184_p10), %s592_s15, 8  ;;  %s218_s11 = scalar_lea.vmem (!%p184_p10), [#allocation3], %s454_s9 }
  0x11   : > { %s348_s18 = sshll.u32 (!%p184_p10), %s218_s11, 4  ;;  %s695_s23 = scalar_lea.hbm (!%p184_p10), %s738_s3, %s466_s10  ;;  %s349_s18 = int_to_ptr.vmem [resolvable:$true] %s348_s18 }
  0x12   : > { %s332_s26 = scalar_lea.sflag (!%p184_p10), [#allocation4], %s216_s8  ;;  %s524_s27 = scalar_lea.vmem (!%p184_p10), %s349_s18, 256 }
  0x13   : > { %p525_p12 = scmp.ne.s32.totalorder (!%p184_p10), %s349_s18, %s524_s27 }
  0x14   : > { %v602_v0 = vmov 0   ;;  %v319_v1 = vld [vmem:[%s737_s2] sm:$0xff]  ;;  %s221_s28 = scalar_select %p220_p11, %s592_s15, 1  ;;  %vm262_vm0 = vcmask 1041408   ;;  %vm258_vm1 = vcmask 31744  }
  0x15   : > { %301 = vmatprep.mubr.bf16.mxu0 %v602_v0  ;;  %523 = vset.pattern.permute.xlu0 %v602_v0  ;;  %v247_v5 = vld [vmem:[%s736_s1] sm:$0xf]  ;;  %p526_p13 = pnand %p525_p12, %p664_p4  ;;  %s603_s15 = smov [#allocation3]  }
  0x16   : > { %322 = vperm.xlu0 %523, %v319_v1   ;;  %s465_s29 = sshll.u32 %s221_s28, 2  ;;  %s528_s28 = sshll.u32 %s603_s15, 4  ;;  %s529_s28 = int_to_ptr.vmem [resolvable:$false] %s528_s28 }
  0x17   : > { %s231_s5 = scalar_lea.vmem %s735_s0, %s465_s29  ;;  %p527_p0 = pneg %p526_p13 }
  0x18   : > { %v457_v2 = vld.sshfl [vmem:[%s231_s5] sm:$0x33 pattern:$0x76325410]  ;;  %s530_s29 = scalar_lea.vmem %s529_s28, 512  ;;  %p531_p1 = scmp.lt.s32.totalorder %s349_s18, %s529_s28 }
  0x19   : > { %v257_v3 = vcombine.high %v457_v2, %v457_v2  ;;  %v264_v4 = vsel %vm262_vm0, %v457_v2, 0  ;;  %p532_p2 = scmp.lt.s32.totalorder %s530_s29, %s524_s27 }
  0x1b   : > { %458 = vmatprep.subr.msk.bf16.mxu0 %vm262_vm0, %v257_v3  ;;  %p533_p3 = por %p532_p2, %p531_p1 }
  0x1c   : > { %284 = vmatpush1.bf16.msra.mxu0 %v264_v4 }
  0x1d   : > { %p534_p5 = pnand %p533_p3, %p527_p0 }
  0x1f   : > { %459 = vmatmul.mubr.msk.bf16.vlgmr.msra.gmra.mxu0 %vm258_vm1, %v247_v5 }
  0x91   : > { %v323_v6 = vpop.permute.xlu0 %322 }
  0xdf   : > { %v303_v7 = vpop.f32.mrf.mxu0 }
  0xe0   : > { %v325_v8 = vadd.f32 %v323_v6, %v303_v7 }
  0xe1   : > { %v305_v9 = vpop.f32.mrf.mxu0 }
  0xe2   : > { %v327_v10 = vmax.f32 %v325_v8, 0.0  ;;  %v326_v11 = vadd.f32 %v323_v6, %v305_v9 }
  0xe3   : > { %v307_v12 = vpop.f32.mrf.mxu0 }
  0xe4   : > { %329 = vst [vmem:[%s218_s11] sm:$0xff] %v327_v10  ;;  %v328_v13 = vmax.f32 %v326_v11, 0.0 }
  0xe5   : > { %v308_v14 = vpop.f32.mrf.mxu0 }
  0xe6   : > { %330 = vst [vmem:[%s218_s11 + $0x8] sm:$0xff] %v328_v13 }
  0xe7   : > { %537 = shalt.err (!%p534_p5)
}
  0xe8   : > { %s538_s30 = scalar_lea.hbm %s695_s23, 256  ;;  %s542_s6 = scalar_lea.hbm %s738_s3, 512 }
  0xe9   : > { %p539_p6 = scmp.ne.s32.totalorder %s695_s23, %s538_s30  ;;  %p543_p10 = scmp.lt.s32.totalorder %s695_s23, %s738_s3 }
  0xea   : > { %p544_p11 = scmp.lt.s32.totalorder %s542_s6, %s538_s30 }
  0xeb   : > { %p540_p7 = pnand %p539_p6, %p664_p4 }
  0xec   : > { %p545_p12 = por %p544_p11, %p543_p10 }
  0xed   : > { %p541_p9 = pneg %p540_p7 }
  0xef   : > { %p546_p13 = pnand %p545_p12, %p541_p9 }
  0xf1   : > { %549 = shalt.err (!%p546_p13)
}
  0xf2   : > { %467 = dma.vmem_to_hbm [thread:$0]  (%p664_p4), %s349_s18, 256, %s695_s23, %s332_s26  }
  0xf3 PF: > { %p473_p0 = scmp.ge.s32.totalorder %s600_s17, 2  ;;  %s360_s9 = sand.u32 1, %s580_s12  }
  0xf4   : > { %s361_s10 = scalar_lea.sflag [#allocation4], %s360_s9 }
  0xf5   : > { %p470_p1 = pnand %p473_p0, %p671_p8 }
  0xf7   : > { %p471_p2 = pneg %p470_p1 }
  0xf9   : > { %575 = dma.done.wait (%p471_p2), %s361_s10, 256  }
  0xfa   : > { %577 = vsyncadd (%p471_p2), %s361_s10, 4294967040  ;;  %s16_s17 = sadd.s32 1, %s600_s17   ;;  %s741_s12 = smov %s584_s13 }
  0xfb   : > { %p13_p3 = scmp.ge.s32.totalorder %s16_s17, 4   ;;  %s742_s13 = smov %s588_s14 }
  0xfc   : > { %s743_s14 = smov %s677_s25  ;;  %s744_s15 = smov %s596_s16 }
  0xfd   : > { %s745_s16 = smov %s747_s20  ;;  %15 = sbr.rel (!%p13_p3) target bundleno = 4 (0x4), region = 78 }
 0x102   :  { %366 = vsyncpa [#allocation4], 1 }
 0x103   :  { %368 = vsyncpa [#allocation4 + $0x1], 1 }

// kernel: tpu_custom_call.1
= control target key start
LH: loop header
LB: loop body
LE: loop exit
PB: predicated region body
PF: predicated region fallthrough
CT: control target
= control target key end

     0   :  { %8 = vsyncpa [#allocation4], 0  ;;  %s735_s0 = inlined_call_operand.vmem [shape: bf16[2,4,256], index: 0, kind: input, shape index: {}]   ;;  %s736_s1 = inlined_call_operand.vmem [shape: bf16[8,4], index: 1, kind: input, shape index: {}]   ;;  %s737_s2 = inlined_call_operand.vmem [shape: f32[8,1], index: 2, kind: input, shape index: {}]   ;;  %s738_s3 = inlined_call_operand.hbm [shape: f32[2,8,256], index: 3, kind: output, shape index: {}]  }
   0x1   :  { %10 = vsyncpa [#allocation4 + $0x1], 0  ;;  %s624_s12 = smov 0   ;;  %s626_s13 = smov 0  }
   0x2   :  { %s628_s14 = smov 0   ;;  %s630_s15 = smov 0  }
   0x3   :  { %s632_s16 = smov 0   ;;  %s634_s17 = smov 0  }
   0x4 LB: > { %s448_s18 = sadd.s32 4294967295, %s600_s17   ;;  %s449_s19 = sadd.s32 4294967294, %s600_s17   ;;  %s600_s17 = sphi %s634_s17, %s16_s17   ;;  %s596_s16 = sphi %s632_s16, %s745_s16   ;;  %s592_s15 = sphi %s630_s15, %s744_s15   ;;  %s588_s14 = sphi %s628_s14, %s743_s14   ;;  %s584_s13 = sphi %s626_s13, %s742_s13   ;;  %s580_s12 = sphi %s624_s12, %s741_s12  }
   0x5   : > { %s35_s20 = sadd.s32 1, %s596_s16  ;;  %s121_s21 = sadd.s32 1, %s588_s14 }
   0x6   : > { %p37_p0 = scmp.ge.s32.totalorder %s35_s20, 2  ;;  %p131_p1 = scmp.ne.s32.totalorder %s588_s14, %s584_s13 }
   0x7   : > { %p132_p2 = scmp.eq.s32.totalorder %s448_s18, 1  ;;  %p137_p3 = scmp.ne.s32.totalorder %s584_s13, %s580_s12 }
   0x8   : > { %s747_s20 = smov (%p37_p0, %s35_s20), 0  ;;  %p138_p5 = scmp.eq.s32.totalorder %s449_s19, 1 }
   0x9   : > { %p664_p4 = por %p132_p2, %p131_p1  ;;  %s116_s23 = ssub.s32 %s596_s16, %s747_s20 }
   0xa   : > { %p453_p6 = scmp.ge.s32.totalorder %s600_s17, 1  ;;  %p119_p7 = scmp.eq.s32.totalorder %s116_s23, 0 }
   0xb   : > { %p671_p8 = por %p138_p5, %p137_p3  ;;  %p183_p9 = scmp.lt.s32.totalorder %s600_s17, 3 }
   0xc   : > { %s677_s25 = scalar_select %p119_p7, %s588_s14, %s121_s21  }
   0xd   : > { %p184_p10 = pnand %p453_p6, %p183_p9 }
   0xe   : > { %p220_p11 = scmp.lt.s32.totalorder (!%p184_p10), %s592_s15, 1  ;;  %s216_s8 = sand.u32 (!%p184_p10), 1, %s584_s13  }
   0xf   : > { %187 = sbr.rel (%p184_p10) target bundleno = 243 (0xf3), region = 32  ;;  %s454_s9 = sshll.u32 (!%p184_p10), %s216_s8, 4 }
  0x10   : > { %s466_s10 = sshll.u32 (!%p184_p10), %s592_s15, 8  ;;  %s218_s11 = scalar_lea.vmem (!%p184_p10), [#allocation3], %s454_s9 }
  0x11   : > { %s348_s18 = sshll.u32 (!%p184_p10), %s218_s11, 4  ;;  %s695_s23 = scalar_lea.hbm (!%p184_p10), %s738_s3, %s466_s10  ;;  %s349_s18 = int_to_ptr.vmem [resolvable:$true] %s348_s18 }
  0x12   : > { %s332_s26 = scalar_lea.sflag (!%p184_p10), [#allocation4], %s216_s8  ;;  %s524_s27 = scalar_lea.vmem (!%p184_p10), %s349_s18, 256 }
  0x13   : > { %p525_p12 = scmp.ne.s32.totalorder (!%p184_p10), %s349_s18, %s524_s27 }
  0x14   : > { %v602_v0 = vmov 0   ;;  %v319_v1 = vld [vmem:[%s737_s2] sm:$0xff]  ;;  %s221_s28 = scalar_select %p220_p11, %s592_s15, 1  ;;  %vm262_vm0 = vcmask 1041408   ;;  %vm258_vm1 = vcmask 31744  }
  0x15   : > { %301 = vmatprep.mubr.bf16.mxu0 %v602_v0  ;;  %523 = vset.pattern.permute.xlu0 %v602_v0  ;;  %v247_v5 = vld [vmem:[%s736_s1] sm:$0xf]  ;;  %p526_p13 = pnand %p525_p12, %p664_p4  ;;  %s603_s15 = smov [#allocation3]  }
  0x16   : > { %322 = vperm.xlu0 %523, %v319_v1   ;;  %s465_s29 = sshll.u32 %s221_s28, 2  ;;  %s528_s28 = sshll.u32 %s603_s15, 4  ;;  %s529_s28 = int_to_ptr.vmem [resolvable:$false] %s528_s28 }
  0x17   : > { %s231_s5 = scalar_lea.vmem %s735_s0, %s465_s29  ;;  %p527_p0 = pneg %p526_p13 }
  0x18   : > { %v457_v2 = vld.sshfl [vmem:[%s231_s5] sm:$0x33 pattern:$0x76325410]  ;;  %s530_s29 = scalar_lea.vmem %s529_s28, 512  ;;  %p531_p1 = scmp.lt.s32.totalorder %s349_s18, %s529_s28 }
  0x19   : > { %v257_v3 = vcombine.high %v457_v2, %v457_v2  ;;  %v264_v4 = vsel %vm262_vm0, %v457_v2, 0  ;;  %p532_p2 = scmp.lt.s32.totalorder %s530_s29, %s524_s27 }
  0x1b   : > { %458 = vmatprep.subr.msk.bf16.mxu0 %vm262_vm0, %v257_v3  ;;  %p533_p3 = por %p532_p2, %p531_p1 }
  0x1c   : > { %284 = vmatpush1.bf16.msra.mxu0 %v264_v4 }
  0x1d   : > { %p534_p5 = pnand %p533_p3, %p527_p0 }
  0x1f   : > { %459 = vmatmul.mubr.msk.bf16.vlgmr.msra.gmra.mxu0 %vm258_vm1, %v247_v5 }
  0x91   : > { %v323_v6 = vpop.permute.xlu0 %322 }
  0xdf   : > { %v303_v7 = vpop.f32.mrf.mxu0 }
  0xe0   : > { %v325_v8 = vadd.f32 %v323_v6, %v303_v7 }
  0xe1   : > { %v305_v9 = vpop.f32.mrf.mxu0 }
  0xe2   : > { %v327_v10 = vmax.f32 %v325_v8, 0.0  ;;  %v326_v11 = vadd.f32 %v323_v6, %v305_v9 }
  0xe3   : > { %v307_v12 = vpop.f32.mrf.mxu0 }
  0xe4   : > { %329 = vst [vmem:[%s218_s11] sm:$0xff] %v327_v10  ;;  %v328_v13 = vmax.f32 %v326_v11, 0.0 }
  0xe5   : > { %v308_v14 = vpop.f32.mrf.mxu0 }
  0xe6   : > { %330 = vst [vmem:[%s218_s11 + $0x8] sm:$0xff] %v328_v13 }
  0xe7   : > { %537 = shalt.err (!%p534_p5)
}
  0xe8   : > { %s538_s30 = scalar_lea.hbm %s695_s23, 256  ;;  %s542_s6 = scalar_lea.hbm %s738_s3, 512 }
  0xe9   : > { %p539_p6 = scmp.ne.s32.totalorder %s695_s23, %s538_s30  ;;  %p543_p10 = scmp.lt.s32.totalorder %s695_s23, %s738_s3 }
  0xea   : > { %p544_p11 = scmp.lt.s32.totalorder %s542_s6, %s538_s30 }
  0xeb   : > { %p540_p7 = pnand %p539_p6, %p664_p4 }
  0xec   : > { %p545_p12 = por %p544_p11, %p543_p10 }
  0xed   : > { %p541_p9 = pneg %p540_p7 }
  0xef   : > { %p546_p13 = pnand %p545_p12, %p541_p9 }
  0xf1   : > { %549 = shalt.err (!%p546_p13)
}
  0xf2   : > { %467 = dma.vmem_to_hbm [thread:$0]  (%p664_p4), %s349_s18, 256, %s695_s23, %s332_s26  }
  0xf3 PF: > { %p473_p0 = scmp.ge.s32.totalorder %s600_s17, 2  ;;  %s360_s9 = sand.u32 1, %s580_s12  }
  0xf4   : > { %s361_s10 = scalar_lea.sflag [#allocation4], %s360_s9 }
  0xf5   : > { %p470_p1 = pnand %p473_p0, %p671_p8 }
  0xf7   : > { %p471_p2 = pneg %p470_p1 }
  0xf9   : > { %575 = dma.done.wait (%p471_p2), %s361_s10, 256  }
  0xfa   : > { %577 = vsyncadd (%p471_p2), %s361_s10, 4294967040  ;;  %s16_s17 = sadd.s32 1, %s600_s17   ;;  %s741_s12 = smov %s584_s13 }
  0xfb   : > { %p13_p3 = scmp.ge.s32.totalorder %s16_s17, 4   ;;  %s742_s13 = smov %s588_s14 }
  0xfc   : > { %s743_s14 = smov %s677_s25  ;;  %s744_s15 = smov %s596_s16 }
  0xfd   : > { %s745_s16 = smov %s747_s20  ;;  %15 = sbr.rel (!%p13_p3) target bundleno = 4 (0x4), region = 78 }
 0x102   :  { %366 = vsyncpa [#allocation4], 1 }
 0x103   :  { %368 = vsyncpa [#allocation4 + $0x1], 1 }

</bundles_post_ra>
